<compile_context>
chip_gen: v6e
topology: v6e:2x2x1
jax: 0.10.0
libtpu: 0.0.40
codegen_flags: <defaults>
</compile_context>

<pallas_src>
import functools

import jax
import jax.numpy as jnp
from jax.experimental import pallas as pl
from jax.experimental.pallas import tpu as pltpu


def _srm_kernel(x_ref, p_ref, o_ref, *, inv_n, inv_nm1):
    """One row-block per grid step.

    x_ref : (RT, Np)  rows of the flattened input (row = (b, c) pair), native dtype
    p_ref : (RT, 3)   per-row folded params: [w0*scale, w1*scale, shift]  (f32)
    o_ref : (RT, Np)  gated output, native dtype
    """
    xf = x_ref[...].astype(jnp.float32)                     # (RT, Np)

    # One-pass statistics (lane padding is zero, so sums are unaffected).
    s1 = jnp.sum(xf, axis=-1, keepdims=True)                # (RT, 1)
    s2 = jnp.sum(xf * xf, axis=-1, keepdims=True)           # (RT, 1)
    mean = s1 * inv_n
    var = jnp.maximum(s2 - mean * s1, 0.0) * inv_nm1        # unbiased, clamped >= 0
    std = jnp.sqrt(var)

    p = p_ref[...]                                          # (RT, 3) f32
    z = p[:, 0:1] * mean + p[:, 1:2] * std + p[:, 2:3]      # conv(k=2,groups=C) + BN
    g = jax.nn.sigmoid(z)                                   # (RT, 1)

    # Gate in the native dtype (bf16 stays bf16 on v6e/v7x VPUs).
    o_ref[...] = x_ref[...] * g.astype(o_ref.dtype)


def _vmem_plan():
    """Chip-aware (block_budget_bytes, vmem_limit_bytes)."""
    try:
        info = pltpu.get_tpu_info()
        cap = int(getattr(info, "vmem_capacity_bytes", 64 << 20))
    except Exception:
        cap = 64 << 20                      # conservative: v7x per-TC VMEM
    budget = int(cap * 0.55)                # blocks (2x-buffered in/out + f32 temps)
    limit = int(cap * 0.75)                 # explicit scoped-VMEM limit with headroom
    return budget, limit


def _pick_row_tile(rows, n_pad, elem_bytes, budget_bytes):
    """Largest multiple-of-8 row tile whose buffered blocks fit the VMEM budget."""
    # Per element: 2x-buffered input + 2x-buffered output (native dtype)
    # + ~2 full-tile f32 temporaries inside the kernel body.
    bytes_per_row = n_pad * (4 * elem_bytes + 8)
    rt = max(8, (budget_bytes // max(bytes_per_row, 1)) // 8 * 8)
    rows8 = ((rows + 7) // 8) * 8
    rt = min(rt, rows8)
    # Keep >= 2 grid steps when possible so v7x's two TensorCores both work.
    if rt == rows8 and rows8 >= 16:
        rt = max(8, (rows8 // 2) // 8 * 8)
    return rt


def srm_forward(x, w_cfc, bn_scale, bn_shift):
    """x: (B, C, H, W); w_cfc: (C, 2) grouped conv weight; bn_scale/bn_shift: (C,)."""
    b, c, h, w = x.shape
    n = h * w
    rows = b * c
    dtype = x.dtype
    elem_bytes = jnp.dtype(dtype).itemsize

    n_pad = ((n + 127) // 128) * 128
    budget, vmem_limit = _vmem_plan()
    rt = _pick_row_tile(rows, n_pad, elem_bytes, budget)
    rows_pad = ((rows + rt - 1) // rt) * rt

    xr = x.reshape(rows, n)
    if rows_pad != rows or n_pad != n:
        # Zero padding: does not change s1/s2; padded rows/lanes are sliced off.
        xr = jnp.pad(xr, ((0, rows_pad - rows), (0, n_pad - n)))

    # Fold eval-mode BN affine into the grouped k=2 conv weights (per channel),
    # then expand per-row (row index = b_idx * C + c_idx).
    w0 = (w_cfc[:, 0] * bn_scale).astype(jnp.float32)
    w1 = (w_cfc[:, 1] * bn_scale).astype(jnp.float32)
    sh = bn_shift.astype(jnp.float32)
    p = jnp.stack([w0, w1, sh], axis=-1)                     # (C, 3)
    p = jnp.tile(p, (b, 1))                                  # (rows, 3)
    if rows_pad != rows:
        p = jnp.pad(p, ((0, rows_pad - rows), (0, 0)))

    kernel = functools.partial(
        _srm_kernel, inv_n=1.0 / n, inv_nm1=1.0 / max(n - 1, 1))

    out = pl.pallas_call(
        kernel,
        out_shape=jax.ShapeDtypeStruct((rows_pad, n_pad), dtype),
        grid=(rows_pad // rt,),
        in_specs=[
            pl.BlockSpec((rt, n_pad), lambda i: (i, 0)),
            pl.BlockSpec((rt, 3), lambda i: (i, 0)),
        ],
        out_specs=pl.BlockSpec((rt, n_pad), lambda i: (i, 0)),
        compiler_params=pltpu.CompilerParams(
            dimension_semantics=("parallel",),
            vmem_limit_bytes=vmem_limit),
    )(xr, p)

    out = out[:rows, :n]
    return out.reshape(b, c, h, w)


def reference(x, w_cfc, bn_scale, bn_shift):
    """Pure-JAX reference matching the PyTorch forward (eval-mode BN)."""
    b, c, h, w = x.shape
    xf = x.reshape(b, c, h * w).astype(jnp.float32)
    mean = xf.mean(-1)                                       # (b, c)
    std = jnp.std(xf, axis=-1, ddof=1)                       # (b, c), unbiased
    z = w_cfc[None, :, 0] * mean + w_cfc[None, :, 1] * std   # grouped conv, k=2
    g = jax.nn.sigmoid(z * bn_scale[None, :] + bn_shift[None, :])
    return (x.astype(jnp.float32) * g[:, :, None, None]).astype(x.dtype)


if __name__ == "__main__":
    key = jax.random.PRNGKey(0)
    kx, kw = jax.random.split(key)

    B, C, H, W = 2, 4, 16, 16
    x = jax.random.normal(kx, (B, C, H, W), dtype=jnp.float32)

    # Conv1d(channel, channel, kernel_size=2, groups=channel, bias=False)
    # -> weight shape (C, 1, 2); stored here as (C, 2).
    w_cfc = jax.random.normal(kw, (C, 2), dtype=jnp.float32) * 0.5

    # BatchNorm1d(channel), eval semantics with deterministic init:
    # gamma=1, beta=0, running_mean=0, running_var=1, eps=1e-5 -> scale/shift.
    eps = 1e-5
    gamma = jnp.ones((C,), jnp.float32)
    beta = jnp.zeros((C,), jnp.float32)
    r_mean = jnp.zeros((C,), jnp.float32)
    r_var = jnp.ones((C,), jnp.float32)
    bn_scale = gamma / jnp.sqrt(r_var + eps)
    bn_shift = beta - r_mean * bn_scale

    out = srm_forward(x, w_cfc, bn_scale, bn_shift)
    out = jax.block_until_ready(out)

    ref = reference(x, w_cfc, bn_scale, bn_shift)
    assert out.shape == (B, C, H, W)
    assert jnp.allclose(out, ref, rtol=1e-3, atol=1e-4), (
        f"max abs err = {jnp.max(jnp.abs(out - ref))}")

    print("KERNEL_OK")
</pallas_src>

<mosaic_0001>
module attributes {stable_mosaic.version = 11 : i64} {
  func.func @_srm_kernel(%arg0: i32, %arg1: memref<8x256xf32, #tpu.memory_space<vmem>>, %arg2: memref<8x3xf32, #tpu.memory_space<vmem>>, %arg3: memref<8x256xf32, #tpu.memory_space<vmem>>) attributes {dimension_semantics = [#tpu.dimension_semantics<parallel>], iteration_bounds = array<i64: 1>, scalar_prefetch = 0 : i64, scratch_operands = 0 : i64, tpu.core_type = #tpu.core_type<tc>, window_params = [{transform_indices = @transform_0, window_bounds = array<i64: 8, 256>}, {transform_indices = @transform_1, window_bounds = array<i64: 8, 3>}, {transform_indices = @transform_2, window_bounds = array<i64: 8, 256>}]} {
    %c0 = arith.constant 0 : index
    %c0_0 = arith.constant 0 : index
    %0 = vector.load %arg1[%c0, %c0_0] : memref<8x256xf32, #tpu.memory_space<vmem>>, vector<8x256xf32>
    %cst = arith.constant dense<0.000000e+00> : vector<8xf32>
    %1 = vector.multi_reduction <add>, %0, %cst [1] : vector<8x256xf32> to vector<8xf32>
    %2 = vector.shape_cast %1 : vector<8xf32> to vector<8x1xf32>
    %3 = arith.mulf %0, %0 : vector<8x256xf32>
    %cst_1 = arith.constant dense<0.000000e+00> : vector<8xf32>
    %4 = vector.multi_reduction <add>, %3, %cst_1 [1] : vector<8x256xf32> to vector<8xf32>
    %5 = vector.shape_cast %4 : vector<8xf32> to vector<8x1xf32>
    %cst_2 = arith.constant 3.906250e-03 : f32
    %6 = vector.broadcast %cst_2 : f32 to vector<8x1xf32>
    %7 = arith.mulf %2, %6 : vector<8x1xf32>
    %8 = arith.mulf %7, %2 : vector<8x1xf32>
    %9 = arith.subf %5, %8 : vector<8x1xf32>
    %cst_3 = arith.constant 0.000000e+00 : f32
    %10 = vector.broadcast %cst_3 : f32 to vector<8x1xf32>
    %11 = arith.maximumf %9, %10 : vector<8x1xf32>
    %cst_4 = arith.constant 0.00392156886 : f32
    %12 = vector.broadcast %cst_4 : f32 to vector<8x1xf32>
    %13 = arith.mulf %11, %12 : vector<8x1xf32>
    %14 = math.sqrt %13 : vector<8x1xf32>
    %c0_5 = arith.constant 0 : index
    %c0_6 = arith.constant 0 : index
    %15 = vector.load %arg2[%c0_5, %c0_6] : memref<8x3xf32, #tpu.memory_space<vmem>>, vector<8x3xf32>
    %16 = vector.extract_strided_slice %15 {offsets = [0, 0], sizes = [8, 1], strides = [1, 1]} : vector<8x3xf32> to vector<8x1xf32>
    %17 = arith.mulf %16, %7 : vector<8x1xf32>
    %18 = vector.extract_strided_slice %15 {offsets = [0, 1], sizes = [8, 1], strides = [1, 1]} : vector<8x3xf32> to vector<8x1xf32>
    %19 = arith.mulf %18, %14 : vector<8x1xf32>
    %20 = arith.addf %17, %19 : vector<8x1xf32>
    %21 = vector.extract_strided_slice %15 {offsets = [0, 2], sizes = [8, 1], strides = [1, 1]} : vector<8x3xf32> to vector<8x1xf32>
    %22 = arith.addf %20, %21 : vector<8x1xf32>
    %23 = arith.negf %22 : vector<8x1xf32>
    %24 = math.exp %23 : vector<8x1xf32>
    %cst_7 = arith.constant 1.000000e+00 : f32
    %25 = vector.broadcast %cst_7 : f32 to vector<8x1xf32>
    %26 = arith.addf %25, %24 : vector<8x1xf32>
    %27 = arith.divf %25, %26 : vector<8x1xf32>
    %c0_8 = arith.constant 0 : index
    %c0_9 = arith.constant 0 : index
    %28 = vector.load %arg1[%c0_8, %c0_9] : memref<8x256xf32, #tpu.memory_space<vmem>>, vector<8x256xf32>
    %29 = vector.broadcast %27 : vector<8x1xf32> to vector<8x256xf32>
    %30 = arith.mulf %28, %29 : vector<8x256xf32>
    %c0_10 = arith.constant 0 : index
    %c0_11 = arith.constant 0 : index
    %31 = vector.load %arg3[%c0_10, %c0_11] : memref<8x256xf32, #tpu.memory_space<vmem>>, vector<8x256xf32>
    tpu.vector_store %arg3[%c0_10, %c0_11], %30 {strides = array<i32>} : memref<8x256xf32, #tpu.memory_space<vmem>>, vector<8x256xf32>,
    return
  }
  func.func @transform_0(%arg0: i32) -> (i32, i32) {
    %c0_i32 = arith.constant 0 : i32
    %c0_i32_0 = arith.constant 0 : i32
    return %arg0, %c0_i32 : i32, i32
  }
  func.func @transform_1(%arg0: i32) -> (i32, i32) {
    %c0_i32 = arith.constant 0 : i32
    %c0_i32_0 = arith.constant 0 : i32
    return %arg0, %c0_i32 : i32, i32
  }
  func.func @transform_2(%arg0: i32) -> (i32, i32) {
    %c0_i32 = arith.constant 0 : i32
    %c0_i32_0 = arith.constant 0 : i32
    return %arg0, %c0_i32 : i32, i32
  }
}

</mosaic_0001>

<bundles_post_ra>
// kernel: tpu_custom_call.1
= control target key start
LH: loop header
LB: loop body
LE: loop exit
PB: predicated region body
PF: predicated region fallthrough
CT: control target
= control target key end

     0   :  { %7 = vsyncpa [#allocation3], 0  ;;  %s175_s0 = inlined_call_operand.hbm [shape: f32[8,256], index: 0, kind: input, shape index: {}]   ;;  %s176_s1 = inlined_call_operand.vmem [shape: f32[8,3], index: 1, kind: input, shape index: {}]   ;;  %s177_s2 = inlined_call_operand.hbm [shape: f32[8,256], index: 2, kind: output, shape index: {}]  }
   0x1   :  { %8 = vsyncpa [#allocation4], 0  ;;  %s146_s9 = smov [#allocation2]  }
   0x2   :  { %s15_s10 = sshll.u32 %s146_s9, 4  ;;  %s16_s10 = int_to_ptr.vmem [resolvable:$true] %s15_s10 }
   0x3   :  { %s110_s11 = scalar_lea.vmem %s16_s10, 256  ;;  %p115_p1 = scmp.lt.s32.totalorder %s16_s10, %s16_s10 }
   0x4   :  { %p111_p0 = scmp.ne.s32.totalorder %s16_s10, %s110_s11  ;;  %p116_p2 = scmp.lt.s32.totalorder %s110_s11, %s110_s11 }
   0x6   :  { %p117_p3 = por %p116_p2, %p115_p1 }
   0x8   :  { %p118_p4 = pnand %p117_p3, %p111_p0 }
   0xa   :  { %121 = shalt.err (!%p118_p4)
}
   0xb   :  { %18 = dma.hbm_to_vmem [thread:$0]  %s175_s0, 256, %s16_s10, [#allocation3]  }
   0xc   :  { %142 = dma.done.wait [#allocation3], 256  }
   0xd   :  { %143 = vsyncadd [#allocation3], 4294967040  ;;  %v24_v0 = vld [vmem:[#allocation2] sm:$0xff]  ;;  %v25_v1 = vld [vmem:[#allocation2 + $0x8] sm:$0xff]  ;;  %s147_s0 = smov 127   ;;  %s148_s16 = smov 126  }
   0xe   :  { %v26_v2 = vadd.f32 %v25_v1, %v24_v0  ;;  %v29_v3 = vmul.f32 %v24_v0, %v24_v0  ;;  %v30_v4 = vmul.f32 %v25_v1, %v25_v1  ;;  %v46_v7 = vld [vmem:[%s176_s1] sm:$0xff]  ;;  %v149_v21 = vmov 0   ;;  %s150_s1 = smov [#allocation5]  }
   0xf   :  { %95 = vset.pattern.permute.xlu0 %v149_v21  ;;  %s80_s17 = sshll.u32 %s150_s1, 4  ;;  %s81_s17 = int_to_ptr.vmem [resolvable:$true] %s80_s17 }
  0x10   :  { %27 = vadd.xlane.f32.xlu0 %v26_v2  ;;  %v31_v5 = vadd.f32 %v30_v4, %v29_v3  ;;  %s122_s18 = scalar_lea.vmem %s81_s17, 256  ;;  %p127_p6 = scmp.lt.s32.totalorder %s81_s17, %s81_s17 }
  0x11   :  { %p123_p5 = scmp.ne.s32.totalorder %s81_s17, %s122_s18  ;;  %p128_p7 = scmp.lt.s32.totalorder %s122_s18, %s122_s18 }
  0x13   :  { %p129_p8 = por %p128_p7, %p127_p6 }
  0x14   :  { %32 = vadd.xlane.f32.xlu0 %v31_v5 }
  0x15   :  { %p130_p9 = pnand %p129_p8, %p123_p5 }
  0x99   :  { %v28_v6 = vpop.xlane.xlu0 %27 }
  0x9a   :  { %v34_v8 = vmul.f32 0.00390625, %v28_v6 }
  0x9c   :  { %v35_v9 = vmul.f32 %v34_v8, %v28_v6  ;;  %v47_v10 = vmul.f32 %v46_v7, %v34_v8 }
  0x9d   :  { %v33_v11 = vpop.xlane.xlu0 %32 }
  0x9e   :  { %v36_v12 = vsub.f32 %v33_v11, %v35_v9 }
  0xa0   :  { %v37_v13 = vmax.f32 %v36_v12, 0.0 }
  0xa2   :  { %v38_v14 = vmul.f32 0.003921569, %v37_v13 }
  0xa4   :  { %96 = vrsqrt.f32 %v38_v14  ;;  %vm41_vm0 = vcmp.eq.f32.partialorder %v38_v14, inf  ;;  %v44_v17 = vand.u32 2147483648, %v38_v14  ;;  %vm43_vm1 = vcmp.eq.f32.partialorder %v38_v14, 0.0 }
  0xb1   :  { %v97_v15 = vpop.eup %96 }
  0xb2   :  { %v40_v16 = vmul.f32 %v97_v15, %v38_v14 }
  0xb4   :  { %v42_v18 = vsel %vm41_vm0, %v38_v14, %v40_v16 }
  0xb5   :  { %v45_v19 = vsel %vm43_vm1, %v44_v17, %v42_v18 }
  0xb6   :  { %v48_v20 = vmul.f32 %v46_v7, %v45_v19 }
  0xb8   :  { %50 = vrot.lane.b32.xlu1 %v48_v20, %s147_s0 }
  0xbc   :  { %55 = vrot.lane.b32.xlu1 %v46_v7, %s148_s16 }
 0x12a   :  { %v51_v22 = vpop.permute.xlu1 %50 }
 0x12b   :  { %v53_v23 = vadd.f32 %v51_v22, %v47_v10 }
 0x12e   :  { %v56_v24 = vpop.permute.xlu1 %55 }
 0x12f   :  { %v58_v25 = vadd.f32 %v56_v24, %v53_v23 }
 0x131   :  { %v89_v26 = vmul.f32 -1.442695, %v58_v25 }
 0x133   :  { %98 = vpow2.f32 %v89_v26 }
 0x140   :  { %v99_v27 = vpop.eup %98 }
 0x141   :  { %v62_v28 = vadd.f32 1.0, %v99_v27 }
 0x143   :  { %100 = vrcp.f32 %v62_v28 }
 0x150   :  { %v101_v29 = vpop.eup %100 }
 0x151   :  { %67 = vperm.xlu0 %95, %v101_v29  }
 0x1cc   :  { %v68_v30 = vpop.permute.xlu0 %67 }
 0x1cd   :  { %v70_v31 = vmul.f32 %v68_v30, %v24_v0  ;;  %v71_v32 = vmul.f32 %v68_v30, %v25_v1 }
 0x1cf   :  { %72 = vst [vmem:[#allocation5] sm:$0xff] %v70_v31  ;;  %73 = vst [vmem:[#allocation5 + $0x8] sm:$0xff] %v71_v32 }
 0x1d0   :  { %133 = shalt.err (!%p130_p9)
}
 0x1d1   :  { %83 = dma.vmem_to_hbm [thread:$0]  %s81_s17, 256, %s177_s2, [#allocation4]  }
 0x1d2   :  { %144 = dma.done.wait [#allocation4], 256  }
 0x1d3   :  { %145 = vsyncadd [#allocation4], 4294967040 }
 0x1d4   :  { %87 = vsyncpa [#allocation3], 1 }
 0x1d5   :  { %88 = vsyncpa [#allocation4], 1 }

</bundles_post_ra>
